<compile_context>
chip_gen: v7x
topology: tpu7x:2x2x1
jax: 0.10.0
libtpu: 0.0.40
codegen_flags: <defaults>
</compile_context>

<pallas_src>
import functools

import jax
import jax.numpy as jnp
from jax.experimental import pallas as pl
from jax.experimental.pallas import tpu as pltpu

_SMOOTH = 0.0
_EPS = 1e-07

_LANES = 128
_MAX_BLOCK_ROWS = 1024  # (1024, 128) f32 block = 512 KiB per input


def _dice_kernel(x_ref, t_ref, out_ref, *,
                 rows_total, block_rows, blocks_per_slice, need_mask):
    s = pl.program_id(0)  # megacore slice ("parallel")
    j = pl.program_id(1)  # block within slice ("arbitrary" reduction axis)

    @pl.when(j == 0)
    def _():
        out_ref[...] = jnp.zeros_like(out_ref)

    x = x_ref[...].astype(jnp.float32)
    t = t_ref[...].astype(jnp.float32)

    if need_mask:
        # Logical first row of this block (unclamped); rows >= rows_total are
        # either garbage from a partial tail block or duplicates from the
        # clamped index map and must contribute zero.
        row0 = (s * blocks_per_slice + j) * block_rows
        ridx = row0 + jax.lax.broadcasted_iota(jnp.int32, x.shape, 0)
        valid = ridx < rows_total
        x = jnp.where(valid, x, 0.0)
        t = jnp.where(valid, t, 0.0)

    # Fold each (block_rows, 128) tile down to per-lane partial sums (mostly
    # plain VPU vreg adds); keep the running sums in the resident VMEM output
    # block. The expensive cross-lane reduction happens once, in the wrapper.
    pxt = jnp.sum(x * t, axis=0, keepdims=True)  # (1, 128)  intersection
    px = jnp.sum(x, axis=0, keepdims=True)       # (1, 128)  sum(output)
    pt = jnp.sum(t, axis=0, keepdims=True)       # (1, 128)  sum(target)
    out_ref[...] += jnp.concatenate([pxt, px, pt], axis=0)[None]


def dice_loss(output, target, smooth=_SMOOTH, eps=_EPS):
    assert output.shape == target.shape, "output/target shape mismatch"

    n = output.size
    x = output.reshape(-1)
    t = target.reshape(-1)

    # Lane alignment: the (rows, 128) reshape is free when numel % 128 == 0
    # (the common case). Only pad up to a lane boundary otherwise.
    if n % _LANES != 0:
        pad = _LANES - (n % _LANES)
        x = jnp.pad(x, (0, pad))
        t = jnp.pad(t, (0, pad))
    x2d = x.reshape(-1, _LANES)
    t2d = t.reshape(-1, _LANES)
    rows_total = x2d.shape[0]

    block_rows = min(_MAX_BLOCK_ROWS, rows_total)
    total_blocks = (rows_total + block_rows - 1) // block_rows
    # Leading "parallel" axis so v7x's 2 TensorCores each stream half the
    # blocks; sequential (and neutral) on single-core v5e/v6e.
    num_slices = 2 if total_blocks >= 2 else 1
    blocks_per_slice = (total_blocks + num_slices - 1) // num_slices
    need_mask = (total_blocks * block_rows != rows_total
                 or num_slices * blocks_per_slice != total_blocks)

    def in_map(s, j):
        # Clamp so uneven slices never index past the last real block; the
        # kernel's row mask zeroes any duplicated / out-of-range rows.
        return (jnp.minimum(s * blocks_per_slice + j, total_blocks - 1), 0)

    kernel = functools.partial(
        _dice_kernel,
        rows_total=rows_total,
        block_rows=block_rows,
        blocks_per_slice=blocks_per_slice,
        need_mask=need_mask,
    )

    partials = pl.pallas_call(
        kernel,
        out_shape=jax.ShapeDtypeStruct((num_slices, 3, _LANES), jnp.float32),
        grid_spec=pltpu.PrefetchScalarGridSpec(
            num_scalar_prefetch=0,
            grid=(num_slices, blocks_per_slice),
            in_specs=[
                pl.BlockSpec((block_rows, _LANES), in_map),
                pl.BlockSpec((block_rows, _LANES), in_map),
            ],
            out_specs=pl.BlockSpec((1, 3, _LANES), lambda s, j: (s, 0, 0)),
        ),
        compiler_params=pltpu.CompilerParams(
            dimension_semantics=("parallel", "arbitrary"),
        ),
    )(x2d, t2d)

    sums = jnp.sum(partials, axis=(0, 2))  # (3,) = [intersection, sum(x), sum(t)]
    inter, sx, st = sums[0], sums[1], sums[2]
    return 1.0 - (2.0 * inter + smooth) / (sx + st + smooth + eps)


def _reference(output, target, smooth=_SMOOTH, eps=_EPS):
    return 1.0 - (2.0 * jnp.sum(output * target) + smooth) / (
        jnp.sum(output) + jnp.sum(target) + smooth + eps
    )


if __name__ == "__main__":
    key = jax.random.PRNGKey(0)
    k1, k2, k3, k4 = jax.random.split(key, 4)

    # Small segmentation-style DiceLoss input (matches the module's intent).
    output = jax.nn.sigmoid(jax.random.normal(k1, (2, 4, 16, 16), jnp.float32))
    target = (jax.random.uniform(k2, (2, 4, 16, 16)) > 0.5).astype(jnp.float32)

    loss = dice_loss(output, target)
    jax.block_until_ready(loss)
    ref = _reference(output, target)
    assert jnp.allclose(loss, ref, atol=1e-5, rtol=1e-5), (loss, ref)

    # Second check exercising the multi-block / parallel-slice / tail-mask path.
    output2 = jax.nn.sigmoid(jax.random.normal(k3, (2, 8, 96, 96), jnp.float32))
    target2 = (jax.random.uniform(k4, (2, 8, 96, 96)) > 0.5).astype(jnp.float32)

    loss2 = dice_loss(output2, target2)
    jax.block_until_ready(loss2)
    ref2 = _reference(output2, target2)
    assert jnp.allclose(loss2, ref2, atol=1e-5, rtol=1e-5), (loss2, ref2)

    print("KERNEL_OK")
</pallas_src>

<mosaic_0001>
module attributes {stable_mosaic.version = 11 : i64} {
  func.func @_dice_kernel(%arg0: i32, %arg1: i32, %arg2: memref<16x128xf32, #tpu.memory_space<vmem>>, %arg3: memref<16x128xf32, #tpu.memory_space<vmem>>, %arg4: memref<1x3x128xf32, #tpu.memory_space<vmem>>) attributes {dimension_semantics = [#tpu.dimension_semantics<parallel>, #tpu.dimension_semantics<arbitrary>], iteration_bounds = array<i64: 1, 1>, scalar_prefetch = 0 : i64, scratch_operands = 0 : i64, tpu.core_type = #tpu.core_type<tc>, window_params = [{transform_indices = @transform_0, window_bounds = array<i64: 16, 128>}, {transform_indices = @transform_1, window_bounds = array<i64: 16, 128>}, {transform_indices = @transform_2, window_bounds = array<i64: 1, 3, 128>}]} {
    %c0_i32 = arith.constant 0 : i32
    %0 = arith.cmpi eq, %arg1, %c0_i32 : i32
    %1 = arith.extui %0 : i1 to i32
    %c0_i32_0 = arith.constant 0 : i32
    %2 = arith.cmpi ne, %1, %c0_i32_0 : i32
    scf.if %2 {
      %cst_12 = arith.constant 0.000000e+00 : f32
      %17 = vector.broadcast %cst_12 : f32 to vector<1x3x128xf32>
      %c0_13 = arith.constant 0 : index
      %c0_14 = arith.constant 0 : index
      %c0_15 = arith.constant 0 : index
      %18 = vector.load %arg4[%c0_13, %c0_14, %c0_15] : memref<1x3x128xf32, #tpu.memory_space<vmem>>, vector<1x3x128xf32>
      tpu.vector_store %arg4[%c0_13, %c0_14, %c0_15], %17 {strides = array<i32>} : memref<1x3x128xf32, #tpu.memory_space<vmem>>, vector<1x3x128xf32>,
    } else {
    }
    %c0 = arith.constant 0 : index
    %c0_1 = arith.constant 0 : index
    %3 = vector.load %arg2[%c0, %c0_1] : memref<16x128xf32, #tpu.memory_space<vmem>>, vector<16x128xf32>
    %c0_2 = arith.constant 0 : index
    %c0_3 = arith.constant 0 : index
    %4 = vector.load %arg3[%c0_2, %c0_3] : memref<16x128xf32, #tpu.memory_space<vmem>>, vector<16x128xf32>
    %5 = arith.mulf %3, %4 : vector<16x128xf32>
    %cst = arith.constant dense<0.000000e+00> : vector<128xf32>
    %6 = vector.multi_reduction <add>, %5, %cst [0] : vector<16x128xf32> to vector<128xf32>
    %7 = vector.shape_cast %6 : vector<128xf32> to vector<1x128xf32>
    %cst_4 = arith.constant dense<0.000000e+00> : vector<128xf32>
    %8 = vector.multi_reduction <add>, %3, %cst_4 [0] : vector<16x128xf32> to vector<128xf32>
    %9 = vector.shape_cast %8 : vector<128xf32> to vector<1x128xf32>
    %cst_5 = arith.constant dense<0.000000e+00> : vector<128xf32>
    %10 = vector.multi_reduction <add>, %4, %cst_5 [0] : vector<16x128xf32> to vector<128xf32>
    %11 = vector.shape_cast %10 : vector<128xf32> to vector<1x128xf32>
    %c0_6 = arith.constant 0 : index
    %c0_7 = arith.constant 0 : index
    %c0_8 = arith.constant 0 : index
    %12 = vector.load %arg4[%c0_6, %c0_7, %c0_8] : memref<1x3x128xf32, #tpu.memory_space<vmem>>, vector<1x3x128xf32>
    %13 = tpu.concatenate %7, %9, %11 in 0 : vector<1x128xf32>, vector<1x128xf32>, vector<1x128xf32> -> vector<3x128xf32>
    %14 = vector.shape_cast %13 : vector<3x128xf32> to vector<1x3x128xf32>
    %15 = arith.addf %12, %14 : vector<1x3x128xf32>
    %c0_9 = arith.constant 0 : index
    %c0_10 = arith.constant 0 : index
    %c0_11 = arith.constant 0 : index
    %16 = vector.load %arg4[%c0_9, %c0_10, %c0_11] : memref<1x3x128xf32, #tpu.memory_space<vmem>>, vector<1x3x128xf32>
    tpu.vector_store %arg4[%c0_9, %c0_10, %c0_11], %15 {strides = array<i32>} : memref<1x3x128xf32, #tpu.memory_space<vmem>>, vector<1x3x128xf32>,
    return
  }
  func.func @transform_0(%arg0: i32, %arg1: i32) -> (i32, i32) {
    %c1_i32 = arith.constant 1 : i32
    %0 = arith.muli %arg0, %c1_i32 : i32
    %1 = arith.addi %0, %arg1 : i32
    %c0_i32 = arith.constant 0 : i32
    %2 = arith.minsi %1, %c0_i32 : i32
    %c0_i32_0 = arith.constant 0 : i32
    %c0_i32_1 = arith.constant 0 : i32
    return %2, %c0_i32_0 : i32, i32
  }
  func.func @transform_1(%arg0: i32, %arg1: i32) -> (i32, i32) {
    %c1_i32 = arith.constant 1 : i32
    %0 = arith.muli %arg0, %c1_i32 : i32
    %1 = arith.addi %0, %arg1 : i32
    %c0_i32 = arith.constant 0 : i32
    %2 = arith.minsi %1, %c0_i32 : i32
    %c0_i32_0 = arith.constant 0 : i32
    %c0_i32_1 = arith.constant 0 : i32
    return %2, %c0_i32_0 : i32, i32
  }
  func.func @transform_2(%arg0: i32, %arg1: i32) -> (i32, i32, i32) {
    %c0_i32 = arith.constant 0 : i32
    %c0_i32_0 = arith.constant 0 : i32
    %c0_i32_1 = arith.constant 0 : i32
    return %arg0, %c0_i32, %c0_i32_0 : i32, i32, i32
  }
}

</mosaic_0001>

<bundles_post_ra>
// kernel: tpu_custom_call.1
= control target key start
LH: loop header
LB: loop body
LE: loop exit
PB: predicated region body
PF: predicated region fallthrough
CT: control target
= control target key end

     0   :  { %7 = vsyncpa [#allocation3], 0  ;;  %s214_s0 = inlined_call_operand.hbm [shape: f32[16,128], index: 0, kind: input, shape index: {}]   ;;  %s215_s1 = inlined_call_operand.hbm [shape: f32[16,128], index: 1, kind: input, shape index: {}]   ;;  %s216_s2 = inlined_call_operand.vmem [shape: f32[1,3,128], index: 2, kind: output, shape index: {}]  }
   0x1   :  { %8 = vsyncpa [#allocation5], 0  ;;  %s161_s9 = smov [#allocation2]   ;;  %s113_s13 = scalar_lea.hbm %s214_s0, 256 }
   0x2   :  { %s20_s10 = sshll.u32 %s161_s9, 4  ;;  %p114_p0 = scmp.ne.s32.totalorder %s214_s0, %s113_s13  ;;  %s21_s10 = int_to_ptr.vmem [resolvable:$true] %s20_s10 }
   0x3   :  { %p117_p1 = scmp.lt.u32.totalorder %s113_s13, %s214_s0 }
   0x5   :  { %p119_p2 = pnand %p117_p1, %p114_p0 }
   0x7   :  { %122 = shalt.err (!%p119_p2)
}
   0x8   :  { %s123_s18 = scalar_lea.vmem %s21_s10, 256  ;;  %p128_p4 = scmp.lt.s32.totalorder %s21_s10, %s21_s10 }
   0x9   :  { %p124_p3 = scmp.ne.s32.totalorder %s21_s10, %s123_s18  ;;  %p129_p5 = scmp.lt.s32.totalorder %s123_s18, %s123_s18 }
   0xb   :  { %p130_p6 = por %p129_p5, %p128_p4 }
   0xd   :  { %p131_p7 = pnand %p130_p6, %p124_p3 }
   0xf   :  { %134 = shalt.err (!%p131_p7)
}
  0x10   :  { %s162_s19 = smov 128   ;;  %s163_s20 = smov 8  }
  0x11   :  { %26 = dma.hbm_to_vmem [thread:$0]  %s214_s0, 256, %s21_s10, [#allocation3], %s162_s19, %s162_s19, %s163_s20  }
  0x12   :  { %s164_s23 = smov [#allocation4]   ;;  %s135_s27 = scalar_lea.hbm %s215_s1, 256 }
  0x13   :  { %s38_s24 = sshll.u32 %s164_s23, 4  ;;  %p136_p8 = scmp.ne.s32.totalorder %s215_s1, %s135_s27  ;;  %s39_s24 = int_to_ptr.vmem [resolvable:$true] %s38_s24 }
  0x14   :  { %p139_p9 = scmp.lt.u32.totalorder %s135_s27, %s215_s1 }
  0x16   :  { %p141_p10 = pnand %p139_p9, %p136_p8 }
  0x18   :  { %144 = shalt.err (!%p141_p10)
}
  0x19   :  { %s145_s4 = scalar_lea.vmem %s39_s24, 256  ;;  %p150_p12 = scmp.lt.s32.totalorder %s39_s24, %s39_s24 }
  0x1a   :  { %p146_p11 = scmp.ne.s32.totalorder %s39_s24, %s145_s4  ;;  %p151_p13 = scmp.lt.s32.totalorder %s145_s4, %s145_s4 }
  0x1c   :  { %p152_p0 = por %p151_p13, %p150_p12 }
  0x1e   :  { %p153_p1 = pnand %p152_p0, %p146_p11 }
  0x20   :  { %156 = shalt.err (!%p153_p1)
}
  0x21   :  { %44 = dma.hbm_to_vmem [thread:$0]  %s215_s1, 256, %s39_s24, [#allocation5], %s162_s19, %s162_s19, %s163_s20  }
  0x22   :  { %157 = dma.done.wait [#allocation3], 256  }
  0x23   :  { %158 = vsyncadd [#allocation3], 4294967040 }
  0x24   :  { %159 = dma.done.wait [#allocation5], 256  }
  0x25   :  { %160 = vsyncadd [#allocation5], 4294967040  ;;  %v165_v0 = vmov 0.0   ;;  %v64_v1 = vld [vmem:[#allocation2] sm:$0xff]  ;;  %v65_v2 = vld [vmem:[#allocation2 + $0x8] sm:$0xff]  ;;  %vm92_vm0 = vcmask 1040384  }
  0x26   :  { %63 = vst [vmem:[%s216_s2] sm:$0x7] %v165_v0  ;;  %v66_v3 = vld [vmem:[#allocation4] sm:$0xff]  ;;  %v67_v4 = vld [vmem:[#allocation4 + $0x8] sm:$0xff]  ;;  %v77_v6 = vadd.f32 %v65_v2, %v64_v1  ;;  %vm94_vm1 = vcmask 1041408  }
  0x27   :  { %v68_v5 = vmul.f32 %v66_v3, %v64_v1  ;;  %v69_v7 = vmul.f32 %v67_v4, %v65_v2  ;;  %v84_v8 = vadd.f32 %v67_v4, %v66_v3 }
  0x28   :  { %v78_v9 = vrot.slane %v77_v6, 4 }
  0x29   :  { %v70_v10 = vadd.f32 %v69_v7, %v68_v5  ;;  %v85_v11 = vrot.slane %v84_v8, 4 }
  0x2a   :  { %v79_v12 = vadd.f32 %v78_v9, %v77_v6 }
  0x2b   :  { %v71_v13 = vrot.slane %v70_v10, 4  ;;  %v86_v14 = vadd.f32 %v85_v11, %v84_v8 }
  0x2c   :  { %v80_v15 = vrot.slane %v79_v12, 2 }
  0x2d   :  { %v72_v16 = vadd.f32 %v71_v13, %v70_v10  ;;  %v87_v17 = vrot.slane %v86_v14, 2  ;;  %v91_v28 = vld [vmem:[%s216_s2] sm:$0x7] }
  0x2e   :  { %v81_v18 = vadd.f32 %v80_v15, %v79_v12 }
  0x2f   :  { %v73_v19 = vrot.slane %v72_v16, 2  ;;  %v88_v20 = vadd.f32 %v87_v17, %v86_v14 }
  0x30   :  { %v82_v21 = vrot.slane %v81_v18, 1 }
  0x31   :  { %v74_v22 = vadd.f32 %v73_v19, %v72_v16  ;;  %v89_v23 = vrot.slane %v88_v20, 1 }
  0x32   :  { %v83_v25 = vadd.f32 %v82_v21, %v81_v18 }
  0x33   :  { %v75_v24 = vrot.slane %v74_v22, 1  ;;  %v90_v26 = vadd.f32 %v89_v23, %v88_v20 }
  0x35   :  { %v76_v27 = vadd.f32 %v75_v24, %v74_v22 }
  0x37   :  { %v93_v29 = vsel %vm92_vm0, %v76_v27, %v83_v25 }
  0x38   :  { %v95_v30 = vsel %vm94_vm1, %v93_v29, %v90_v26 }
  0x39   :  { %v96_v31 = vadd.f32 %v95_v30, %v91_v28 }
  0x3b   :  { %97 = vst [vmem:[%s216_s2] sm:$0x7] %v96_v31 }
  0x3c   :  { %102 = vsyncpa [#allocation3], 1 }
  0x3d   :  { %103 = vsyncpa [#allocation5], 1 }

</bundles_post_ra>
